<compile_context>
chip_gen: v7x
topology: tpu7x:2x2x1
jax: 0.10.0
libtpu: 0.0.40
codegen_flags: <defaults>
</compile_context>

<pallas_src>
import jax
import jax.numpy as jnp
from jax import lax
from jax.experimental import pallas as pl
from jax.experimental.pallas import tpu as pltpu


def _round_up(a, b):
    return ((a + b - 1) // b) * b


# -------------------- kernels --------------------

def fused_stem_conv_kernel(x_ref, sw_ref, sb_ref, cw_ref, scale_ref, shift_ref, o_ref):
    """Stand-in backbone projection + Conv2d(2048,128,1) + BN + ReLU, fused.

    x_ref:     (TILE_P, Cin)  bf16
    sw_ref:    (Cin, 2048)    bf16  stem projection
    sb_ref:    (1, 2048)      bf16
    cw_ref:    (2048, 128)    bf16  1x1 conv weight
    scale/shift: (1, 128)     f32   folded BatchNorm (+conv bias)
    o_ref:     (TILE_P, 128)  f32
    """
    x = x_ref[...]
    w = sw_ref[...]
    cin = x.shape[1]
    # Depth-Cin (=3) contraction as VPU broadcast MACs in bf16 (bf16 VALU on
    # v6e/v7x => ~half the VALU bundles and half the VMEM of the f32 version);
    # feeding a K=3 contraction to the MXU would waste ~98% of its rows.
    feat = x[:, 0:1] * w[0:1, :]
    for ci in range(1, cin):
        feat = feat + x[:, ci:ci + 1] * w[ci:ci + 1, :]
    feat = feat + sb_ref[...]
    feat = jnp.maximum(feat, 0.0)                       # bf16, stays in VMEM
    # 1x1 conv: bf16 MXU matmul with f32 accumulation, then folded BN + ReLU.
    y = jnp.dot(feat, cw_ref[...], preferred_element_type=jnp.float32)
    y = y * scale_ref[...] + shift_ref[...]
    o_ref[...] = jnp.maximum(y, 0.0).astype(o_ref.dtype)


def encoding_kernel(x_ref, cw_ref, s_ref, e_ref):
    """encoding.nn.Encoding for a block of Bt images.

      A = softmax_k( s_k * ||x_n - c_k||^2 )
      E[b, k, :] = sum_n A[b, n, k] * (x[b, n, :] - c[k, :])
    """
    x = x_ref[...]                      # (Bt, HW, D) f32
    c = cw_ref[...]                     # (K, D)      f32
    s = s_ref[...][None]                # (1, 1, K)

    x2 = jnp.sum(x * x, axis=-1, keepdims=True)               # (Bt, HW, 1)
    c2 = jnp.sum(c * c, axis=-1)[None, None, :]                # (1, 1, K)
    # Cross term in f32: bf16 here caused catastrophic cancellation for x near
    # a codeword (exactly the terms that dominate the softmax).  No batch dims
    # => this lowers as one tall (Bt*HW, D)x(D, K) MXU contraction.
    xc = jnp.einsum('bnd,kd->bnk', x, c,
                    preferred_element_type=jnp.float32)        # (Bt, HW, K)
    dist = jnp.maximum(x2 + c2 - 2.0 * xc, 0.0)                # true squared dist >= 0

    sl = s * dist                                              # scaled_l2
    sl_max = jnp.max(sl, axis=-1, keepdims=True)
    p = jnp.exp(sl - sl_max)
    # EUP approx reciprocal: softmax divide becomes essentially free.
    a = p * pl.reciprocal(jnp.sum(p, axis=-1, keepdims=True), approx=True)

    # aggregate: A^T @ X - colsum(A) * C   (transposes folded into einsum dims)
    ab = a.astype(jnp.bfloat16)
    xb = x.astype(jnp.bfloat16)
    e_agg = jnp.einsum('bnk,bnd->bkd', ab, xb,
                       preferred_element_type=jnp.float32)     # (Bt, K, D)
    asum = jnp.sum(a, axis=1)                                  # (Bt, K)
    e = e_agg - asum[:, :, None] * c[None, :, :]
    e_ref[...] = e.astype(e_ref.dtype)


def norm_linear_kernel(e_ref, w_ref, b_ref, o_ref):
    """encoding.nn.Normalize (L2 over last dim) followed by nn.Linear."""
    e = e_ref[...]
    sumsq = jnp.sum(e * e, axis=-1, keepdims=True)
    en = e * lax.rsqrt(jnp.maximum(sumsq, 1e-24))              # rsqrt -> EUP, no divide
    y = jnp.dot(en.astype(jnp.bfloat16), w_ref[...],
                preferred_element_type=jnp.float32) + b_ref[...]
    o_ref[...] = y.astype(o_ref.dtype)


# -------------------- wrapper --------------------

def deepten_forward(x, params, *, nclass, D=128, K=32, feat_ch=2048, stride=32):
    N, C, H, W = x.shape                       # NCHW
    hf, wf = H // stride, W // stride
    HW = hf * wf
    P = N * HW

    # glue: stride-32 patch mean pool, NCHW -> (P, Cin) channels-last, bf16
    xp = x.reshape(N, C, hf, stride, wf, stride).mean(axis=(3, 5))   # (N, C, hf, wf)
    xp = jnp.transpose(xp, (0, 2, 3, 1)).reshape(P, C).astype(jnp.bfloat16)

    # ---- fused stem + Conv1x1 + BN + ReLU, tiled over positions ----
    # Tile capped at 1024 rows (safe on v7x's 64 MiB VMEM, big enough to
    # amortize per-step overhead on v5e/v6e).  Force >=2 grid steps whenever P
    # allows so v7x's two TensorCores both get work, and balance the tile size
    # so last-tile padding stays below 8*grid rows.
    TILE_MAX = 1024
    P8 = _round_up(P, 8)
    grid_p = max((P8 + TILE_MAX - 1) // TILE_MAX, 2 if P8 >= 16 else 1)
    TILE_P = _round_up(-(-P // grid_p), 8)
    P_pad = TILE_P * grid_p
    if P_pad != P:
        xp = jnp.pad(xp, ((0, P_pad - P), (0, 0)))

    stem_w = params["stem_w"].astype(jnp.bfloat16)
    stem_b = params["stem_b"].astype(jnp.bfloat16)
    conv_w = params["conv_w"].astype(jnp.bfloat16)

    h = pl.pallas_call(
        fused_stem_conv_kernel,
        grid=(grid_p,),
        in_specs=[
            pl.BlockSpec((TILE_P, C), lambda i: (i, 0)),
            pl.BlockSpec((C, feat_ch), lambda i: (0, 0)),
            pl.BlockSpec((1, feat_ch), lambda i: (0, 0)),
            pl.BlockSpec((feat_ch, D), lambda i: (0, 0)),
            pl.BlockSpec((1, D), lambda i: (0, 0)),
            pl.BlockSpec((1, D), lambda i: (0, 0)),
        ],
        out_specs=pl.BlockSpec((TILE_P, D), lambda i: (i, 0)),
        out_shape=jax.ShapeDtypeStruct((P_pad, D), jnp.float32),
        compiler_params=pltpu.CompilerParams(
            dimension_semantics=("parallel",),
            vmem_limit_bytes=40 * 1024 * 1024,
        ),
    )(xp, stem_w, stem_b, conv_w, params["bn_scale"], params["bn_shift"])
    h = h[:P]

    # ---- Encoding(D=128, K=32): grid over batch blocks ----
    Xe = h.reshape(N, HW, D)
    # Bt = ceil(N/2): >=2 grid steps so both v7x TCs get work, fewer launch
    # overheads than Bt=8 blocks; capped so the (Bt, HW, D) f32 block stays
    # a few MiB.
    Bt = min(max(1, (N + 1) // 2), max(1, 8192 // max(HW, 1)))
    N_pad = _round_up(N, Bt)
    if N_pad != N:
        Xe = jnp.pad(Xe, ((0, N_pad - N), (0, 0), (0, 0)))

    E = pl.pallas_call(
        encoding_kernel,
        grid=(N_pad // Bt,),
        in_specs=[
            pl.BlockSpec((Bt, HW, D), lambda b: (b, 0, 0)),
            pl.BlockSpec((K, D), lambda b: (0, 0)),
            pl.BlockSpec((1, K), lambda b: (0, 0)),
        ],
        out_specs=pl.BlockSpec((Bt, K, D), lambda b: (b, 0, 0)),
        out_shape=jax.ShapeDtypeStruct((N_pad, K, D), jnp.float32),
        compiler_params=pltpu.CompilerParams(
            dimension_semantics=("parallel",),
            vmem_limit_bytes=40 * 1024 * 1024,
        ),
    )(Xe, params["codewords"], params["enc_scale"])
    E = E[:N]

    # ---- View(-1, 128*32) then Normalize + Linear ----
    # pad nclass to a multiple of 128 so the final store is lane-dense.
    NC_pad = _round_up(nclass, 128)
    fc_w = params["fc_w"]
    fc_b = params["fc_b"]
    if NC_pad != nclass:
        fc_w = jnp.pad(fc_w, ((0, 0), (0, NC_pad - nclass)))
        fc_b = jnp.pad(fc_b, ((0, 0), (0, NC_pad - nclass)))
    fc_w = fc_w.astype(jnp.bfloat16)

    Ef = E.reshape(N, K * D)
    out = pl.pallas_call(
        norm_linear_kernel,
        out_shape=jax.ShapeDtypeStruct((N, NC_pad), jnp.float32),
        compiler_params=pltpu.CompilerParams(
            vmem_limit_bytes=40 * 1024 * 1024,
        ),
    )(Ef, fc_w, fc_b)
    return out[:, :nclass]


def make_params(key, *, nclass, D=128, K=32, feat_ch=2048, in_ch=3):
    ks = jax.random.split(key, 16)
    eps = 1e-5

    # stand-in backbone projection
    stem_w = jax.random.normal(ks[0], (in_ch, feat_ch), jnp.float32) * 0.2
    stem_b = jax.random.normal(ks[1], (1, feat_ch), jnp.float32) * 0.05

    # Conv2d(2048, 128, 1) weight (stored as (Cin, Cout)) + bias
    conv_w = jax.random.normal(ks[2], (feat_ch, D), jnp.float32) / jnp.sqrt(feat_ch)
    conv_b = jax.random.normal(ks[3], (1, D), jnp.float32) * 0.05

    # BatchNorm2d(128) in eval mode, folded
    gamma = jax.random.uniform(ks[4], (1, D), jnp.float32, 0.5, 1.5)
    beta = jax.random.normal(ks[5], (1, D), jnp.float32) * 0.1
    r_mean = jax.random.normal(ks[6], (1, D), jnp.float32) * 0.1
    r_var = jax.random.uniform(ks[7], (1, D), jnp.float32, 0.5, 1.5)
    bn_scale = gamma / jnp.sqrt(r_var + eps)
    bn_shift = beta + (conv_b - r_mean) * bn_scale

    # Encoding(D=128, K=32) params (same init as PyTorch-Encoding)
    std1 = 1.0 / jnp.sqrt(jnp.float32(K * D))
    codewords = jax.random.uniform(ks[8], (K, D), jnp.float32, -std1, std1)
    enc_scale = jax.random.uniform(ks[9], (1, K), jnp.float32, -1.0, 0.0)

    # Linear(128*32, nclass)
    bound = 1.0 / jnp.sqrt(jnp.float32(K * D))
    fc_w = jax.random.uniform(ks[10], (K * D, nclass), jnp.float32, -bound, bound)
    fc_b = jax.random.uniform(ks[11], (1, nclass), jnp.float32, -bound, bound)

    return dict(stem_w=stem_w, stem_b=stem_b, conv_w=conv_w,
                bn_scale=bn_scale, bn_shift=bn_shift,
                codewords=codewords, enc_scale=enc_scale,
                fc_w=fc_w, fc_b=fc_b)


if __name__ == "__main__":
    key = jax.random.PRNGKey(0)
    k_in, k_par = jax.random.split(key)

    N, Cin, H, W = 2, 3, 64, 64       # stride-32 backbone -> 2x2 feature map
    nclass = 16

    x = jax.random.normal(k_in, (N, Cin, H, W), jnp.float32)
    params = make_params(k_par, nclass=nclass)

    out = deepten_forward(x, params, nclass=nclass)
    out = jax.block_until_ready(out)
    assert out.shape == (N, nclass) and out.dtype == jnp.float32
    assert bool(jnp.all(jnp.isfinite(out)))
    print("KERNEL_OK")
</pallas_src>

<mosaic_0001>
module attributes {stable_mosaic.version = 11 : i64} {
  func.func @fused_stem_conv_kernel(%arg0: i32, %arg1: memref<8x3xbf16, #tpu.memory_space<vmem>>, %arg2: memref<3x2048xbf16, #tpu.memory_space<vmem>>, %arg3: memref<1x2048xbf16, #tpu.memory_space<vmem>>, %arg4: memref<2048x128xbf16, #tpu.memory_space<vmem>>, %arg5: memref<1x128xf32, #tpu.memory_space<vmem>>, %arg6: memref<1x128xf32, #tpu.memory_space<vmem>>, %arg7: memref<8x128xf32, #tpu.memory_space<vmem>>) attributes {dimension_semantics = [#tpu.dimension_semantics<parallel>], iteration_bounds = array<i64: 1>, scalar_prefetch = 0 : i64, scratch_operands = 0 : i64, tpu.core_type = #tpu.core_type<tc>, window_params = [{transform_indices = @transform_0, window_bounds = array<i64: 8, 3>}, {pipeline_mode = #tpu.pipeline_mode<synchronous>, transform_indices = @transform_1, window_bounds = array<i64: 3, 2048>}, {pipeline_mode = #tpu.pipeline_mode<synchronous>, transform_indices = @transform_2, window_bounds = array<i64: 1, 2048>}, {pipeline_mode = #tpu.pipeline_mode<synchronous>, transform_indices = @transform_3, window_bounds = array<i64: 2048, 128>}, {pipeline_mode = #tpu.pipeline_mode<synchronous>, transform_indices = @transform_4, window_bounds = array<i64: 1, 128>}, {pipeline_mode = #tpu.pipeline_mode<synchronous>, transform_indices = @transform_5, window_bounds = array<i64: 1, 128>}, {transform_indices = @transform_6, window_bounds = array<i64: 8, 128>}]} {
    %c0 = arith.constant 0 : index
    %c0_0 = arith.constant 0 : index
    %0 = vector.load %arg1[%c0, %c0_0] : memref<8x3xbf16, #tpu.memory_space<vmem>>, vector<8x3xbf16>
    %c0_1 = arith.constant 0 : index
    %c0_2 = arith.constant 0 : index
    %1 = vector.load %arg2[%c0_1, %c0_2] : memref<3x2048xbf16, #tpu.memory_space<vmem>>, vector<3x2048xbf16>
    %2 = vector.extract_strided_slice %0 {offsets = [0, 0], sizes = [8, 1], strides = [1, 1]} : vector<8x3xbf16> to vector<8x1xbf16>
    %3 = vector.extract_strided_slice %1 {offsets = [0, 0], sizes = [1, 2048], strides = [1, 1]} : vector<3x2048xbf16> to vector<1x2048xbf16>
    %4 = vector.broadcast %2 : vector<8x1xbf16> to vector<8x2048xbf16>
    %5 = vector.broadcast %3 : vector<1x2048xbf16> to vector<8x2048xbf16>
    %6 = arith.mulf %4, %5 : vector<8x2048xbf16>
    %7 = vector.extract_strided_slice %0 {offsets = [0, 1], sizes = [8, 1], strides = [1, 1]} : vector<8x3xbf16> to vector<8x1xbf16>
    %8 = vector.extract_strided_slice %1 {offsets = [1, 0], sizes = [1, 2048], strides = [1, 1]} : vector<3x2048xbf16> to vector<1x2048xbf16>
    %9 = vector.broadcast %7 : vector<8x1xbf16> to vector<8x2048xbf16>
    %10 = vector.broadcast %8 : vector<1x2048xbf16> to vector<8x2048xbf16>
    %11 = arith.mulf %9, %10 : vector<8x2048xbf16>
    %12 = arith.addf %6, %11 : vector<8x2048xbf16>
    %13 = vector.extract_strided_slice %0 {offsets = [0, 2], sizes = [8, 1], strides = [1, 1]} : vector<8x3xbf16> to vector<8x1xbf16>
    %14 = vector.extract_strided_slice %1 {offsets = [2, 0], sizes = [1, 2048], strides = [1, 1]} : vector<3x2048xbf16> to vector<1x2048xbf16>
    %15 = vector.broadcast %13 : vector<8x1xbf16> to vector<8x2048xbf16>
    %16 = vector.broadcast %14 : vector<1x2048xbf16> to vector<8x2048xbf16>
    %17 = arith.mulf %15, %16 : vector<8x2048xbf16>
    %18 = arith.addf %12, %17 : vector<8x2048xbf16>
    %c0_3 = arith.constant 0 : index
    %c0_4 = arith.constant 0 : index
    %19 = vector.load %arg3[%c0_3, %c0_4] : memref<1x2048xbf16, #tpu.memory_space<vmem>>, vector<1x2048xbf16>
    %20 = vector.broadcast %19 : vector<1x2048xbf16> to vector<8x2048xbf16>
    %21 = arith.addf %18, %20 : vector<8x2048xbf16>
    %cst = arith.constant 0.000000e+00 : bf16
    %22 = vector.broadcast %cst : bf16 to vector<8x2048xbf16>
    %23 = arith.maximumf %21, %22 : vector<8x2048xbf16>
    %c0_5 = arith.constant 0 : index
    %c0_6 = arith.constant 0 : index
    %24 = vector.load %arg4[%c0_5, %c0_6] : memref<2048x128xbf16, #tpu.memory_space<vmem>>, vector<2048x128xbf16>
    %cst_7 = arith.constant dense<0.000000e+00> : vector<8x128xf32>
    %25 = tpu.matmul %23, %24, %cst_7 {dimension_numbers = #tpu.dot_dimension_numbers<[1], [0], [0], [1], [0, 0, 1, 1], [], []>} : vector<8x2048xbf16>, vector<2048x128xbf16>, vector<8x128xf32> -> vector<8x128xf32>
    %c0_8 = arith.constant 0 : index
    %c0_9 = arith.constant 0 : index
    %26 = vector.load %arg5[%c0_8, %c0_9] : memref<1x128xf32, #tpu.memory_space<vmem>>, vector<1x128xf32>
    %27 = vector.broadcast %26 : vector<1x128xf32> to vector<8x128xf32>
    %28 = arith.mulf %25, %27 : vector<8x128xf32>
    %c0_10 = arith.constant 0 : index
    %c0_11 = arith.constant 0 : index
    %29 = vector.load %arg6[%c0_10, %c0_11] : memref<1x128xf32, #tpu.memory_space<vmem>>, vector<1x128xf32>
    %30 = vector.broadcast %29 : vector<1x128xf32> to vector<8x128xf32>
    %31 = arith.addf %28, %30 : vector<8x128xf32>
    %cst_12 = arith.constant 0.000000e+00 : f32
    %32 = vector.broadcast %cst_12 : f32 to vector<8x128xf32>
    %33 = arith.maximumf %31, %32 : vector<8x128xf32>
    %c0_13 = arith.constant 0 : index
    %c0_14 = arith.constant 0 : index
    %34 = vector.load %arg7[%c0_13, %c0_14] : memref<8x128xf32, #tpu.memory_space<vmem>>, vector<8x128xf32>
    tpu.vector_store %arg7[%c0_13, %c0_14], %33 {strides = array<i32>} : memref<8x128xf32, #tpu.memory_space<vmem>>, vector<8x128xf32>,
    return
  }
  func.func @transform_0(%arg0: i32) -> (i32, i32) {
    %c0_i32 = arith.constant 0 : i32
    %c0_i32_0 = arith.constant 0 : i32
    return %arg0, %c0_i32 : i32, i32
  }
  func.func @transform_1(%arg0: i32) -> (i32, i32) {
    %c0_i32 = arith.constant 0 : i32
    %c0_i32_0 = arith.constant 0 : i32
    %c0_i32_1 = arith.constant 0 : i32
    return %c0_i32, %c0_i32_0 : i32, i32
  }
  func.func @transform_2(%arg0: i32) -> (i32, i32) {
    %c0_i32 = arith.constant 0 : i32
    %c0_i32_0 = arith.constant 0 : i32
    %c0_i32_1 = arith.constant 0 : i32
    return %c0_i32, %c0_i32_0 : i32, i32
  }
  func.func @transform_3(%arg0: i32) -> (i32, i32) {
    %c0_i32 = arith.constant 0 : i32
    %c0_i32_0 = arith.constant 0 : i32
    %c0_i32_1 = arith.constant 0 : i32
    return %c0_i32, %c0_i32_0 : i32, i32
  }
  func.func @transform_4(%arg0: i32) -> (i32, i32) {
    %c0_i32 = arith.constant 0 : i32
    %c0_i32_0 = arith.constant 0 : i32
    %c0_i32_1 = arith.constant 0 : i32
    return %c0_i32, %c0_i32_0 : i32, i32
  }
  func.func @transform_5(%arg0: i32) -> (i32, i32) {
    %c0_i32 = arith.constant 0 : i32
    %c0_i32_0 = arith.constant 0 : i32
    %c0_i32_1 = arith.constant 0 : i32
    return %c0_i32, %c0_i32_0 : i32, i32
  }
  func.func @transform_6(%arg0: i32) -> (i32, i32) {
    %c0_i32 = arith.constant 0 : i32
    %c0_i32_0 = arith.constant 0 : i32
    return %arg0, %c0_i32 : i32, i32
  }
}

</mosaic_0001>

<bundles_post_ra>
// kernel: tpu_custom_call.1
= control target key start
LH: loop header
LB: loop body
LE: loop exit
PB: predicated region body
PF: predicated region fallthrough
CT: control target
= control target key end

     0   :  { %11 = vsyncpa [#allocation3], 0  ;;  %s3325_s0 = inlined_call_operand.vmem [shape: bf16[8,3], index: 0, kind: input, shape index: {}]   ;;  %s3326_s1 = inlined_call_operand.hbm [shape: bf16[3,2048], index: 1, kind: input, shape index: {}]   ;;  %s3327_s2 = inlined_call_operand.hbm [shape: bf16[1,2048], index: 2, kind: input, shape index: {}]   ;;  %s3328_s3 = inlined_call_operand.hbm [shape: bf16[2048,128], index: 3, kind: input, shape index: {}]   ;;  %s3329_s4 = inlined_call_operand.vmem [shape: f32[1,128], index: 4, kind: input, shape index: {}]   ;;  %s3330_s5 = inlined_call_operand.vmem [shape: f32[1,128], index: 5, kind: input, shape index: {}]   ;;  %s3331_s6 = inlined_call_operand.hbm [shape: f32[8,128], index: 6, kind: output, shape index: {}]  }
   0x1   :  { %12 = vsyncpa [#allocation6], 0 }
   0x2   :  { %13 = vsyncpa [#allocation4], 0  ;;  %s2955_s21 = smov [#allocation5]   ;;  %s2956_s23 = smov [#allocation2]  }
   0x3   :  { %s32_s22 = sshll.u32 %s2955_s21, 4  ;;  %s22_s24 = sshll.u32 %s2956_s23, 4  ;;  %s33_s22 = int_to_ptr.vmem [resolvable:$true] %s32_s22  ;;  %s23_s24 = int_to_ptr.vmem [resolvable:$true] %s22_s24 }
   0x4   :  { %s2861_s27 = scalar_lea.hbm %s3327_s2, 256 }
   0x5   :  { %p2862_p0 = scmp.ne.s32.totalorder %s3327_s2, %s2861_s27  ;;  %p2865_p1 = scmp.lt.u32.totalorder %s2861_s27, %s3327_s2 }
   0x7   :  { %p2867_p2 = pnand %p2865_p1, %p2862_p0 }
   0x9   :  { %2870 = shalt.err (!%p2867_p2)
}
   0xa   :  { %s2871_s8 = scalar_lea.vmem %s33_s22, 256  ;;  %p2876_p4 = scmp.lt.s32.totalorder %s33_s22, %s33_s22 }
   0xb   :  { %p2872_p3 = scmp.ne.s32.totalorder %s33_s22, %s2871_s8  ;;  %p2877_p5 = scmp.lt.s32.totalorder %s2871_s8, %s2871_s8 }
   0xd   :  { %p2878_p6 = por %p2877_p5, %p2876_p4 }
   0xf   :  { %p2879_p7 = pnand %p2878_p6, %p2872_p3 }
  0x11   :  { %2882 = shalt.err (!%p2879_p7)
}
  0x12   :  { %35 = dma.hbm_to_vmem [thread:$0]  %s3327_s2, 256, %s33_s22, [#allocation6]  }
  0x13   :  { %s2883_s13 = scalar_lea.hbm %s3326_s1, 512 }
  0x14   :  { %p2884_p8 = scmp.ne.s32.totalorder %s3326_s1, %s2883_s13  ;;  %p2887_p9 = scmp.lt.u32.totalorder %s2883_s13, %s3326_s1 }
  0x16   :  { %p2889_p10 = pnand %p2887_p9, %p2884_p8 }
  0x18   :  { %2892 = shalt.err (!%p2889_p10)
}
  0x19   :  { %s2893_s18 = scalar_lea.vmem %s23_s24, 512  ;;  %p2898_p12 = scmp.lt.s32.totalorder %s23_s24, %s23_s24 }
  0x1a   :  { %p2894_p11 = scmp.ne.s32.totalorder %s23_s24, %s2893_s18  ;;  %p2899_p13 = scmp.lt.s32.totalorder %s2893_s18, %s2893_s18 }
  0x1c   :  { %p2900_p0 = por %p2899_p13, %p2898_p12 }
  0x1e   :  { %p2901_p1 = pnand %p2900_p0, %p2894_p11 }
  0x20   :  { %2904 = shalt.err (!%p2901_p1)
}
  0x21   :  { %25 = dma.hbm_to_vmem [thread:$0]  %s3326_s1, 512, %s23_s24, [#allocation3]  }
  0x22   :  { %s2957_s20 = smov [#allocation7]   ;;  %s2905_s25 = scalar_lea.hbm %s3328_s3, 16384 }
  0x23   :  { %s41_s21 = sshll.u32 %s2957_s20, 4  ;;  %p2906_p2 = scmp.ne.s32.totalorder %s3328_s3, %s2905_s25  ;;  %s42_s21 = int_to_ptr.vmem [resolvable:$true] %s41_s21 }
  0x24   :  { %p2909_p3 = scmp.lt.u32.totalorder %s2905_s25, %s3328_s3 }
  0x26   :  { %p2911_p4 = pnand %p2909_p3, %p2906_p2 }
  0x28   :  { %2914 = shalt.err (!%p2911_p4)
}
  0x29   :  { %s2915_s30 = scalar_lea.vmem %s42_s21, 16384  ;;  %p2920_p6 = scmp.lt.s32.totalorder %s42_s21, %s42_s21 }
  0x2a   :  { %p2916_p5 = scmp.ne.s32.totalorder %s42_s21, %s2915_s30  ;;  %p2921_p7 = scmp.lt.s32.totalorder %s2915_s30, %s2915_s30 }
  0x2c   :  { %p2922_p8 = por %p2921_p7, %p2920_p6 }
  0x2e   :  { %p2923_p9 = pnand %p2922_p8, %p2916_p5 }
  0x30   :  { %2926 = shalt.err (!%p2923_p9)
}
  0x31   :  { %s2958_s1 = smov 64   ;;  %s2959_s24 = smov 4  }
  0x32   :  { %47 = dma.hbm_to_vmem [thread:$0]  %s3328_s3, 16384, %s42_s21, [#allocation6], %s2958_s1, %s2958_s1, %s2959_s24  }
  0x33   :  { %2949 = dma.done.wait [#allocation3], 512  }
  0x34   :  { %2950 = vsyncadd [#allocation3], 4294966784 }
  0x35   :  { %2951 = dma.done.wait [#allocation6], 16640  }
  0x36   :  { %2952 = vsyncadd [#allocation6], 4294950656  ;;  %v2960_v0 = vmov 0   ;;  %v2961_v1 = vmov 2   ;;  %v62_v2 = vld [vmem:[%s3325_s0] sm:$0xf]  ;;  %v75_v38 = vlaneseq }
  0x37   :  { %2723 = vset.pattern.permute.xlu0 %v2960_v0  ;;  %2725 = vset.pattern.permute.xlu1 %v2961_v1  ;;  %v2727_v3 = vld [vmem:[#allocation7 + $0x40] sm:$0xff]   ;;  %v2962_v7 = vmov 1   ;;  %v2731_v8 = vld [vmem:[#allocation7 + $0x48] sm:$0xff]   ;;  %v2735_v12 = vld [vmem:[#allocation7 + $0x50] sm:$0xff]   ;;  %v2963_v39 = vmov 1983009808  }
  0x38   :  { %69 = vperm.xlu0 %2723, %v62_v2   ;;  %507 = vperm.xlu1 %2725, %v62_v2   ;;  %v2728_v4 = vld [vmem:[#allocation7 + $0xc0] sm:$0xff]   ;;  %v2732_v9 = vld [vmem:[#allocation7 + $0xc8] sm:$0xff]   ;;  %v2736_v13 = vld [vmem:[#allocation7 + $0xd0] sm:$0xff]   ;;  %v85_v40 = vunpack.c.l.s4 %v2963_v39  ;;  %v2964_v41 = vmov 1966171168   ;;  %v76_v43 = vshrl.u32 %v75_v38, 7 }
  0x39   :  { %2535 = vmatprep.subr.bf16.mxu0 %v2727_v3  ;;  %v2729_v5 = vld [vmem:[#allocation7] sm:$0xff]   ;;  %2557 = vmatprep.subr.bf16.mxu1 %v2728_v4  ;;  %v2733_v10 = vld [vmem:[#allocation7 + $0x8] sm:$0xff]   ;;  %v2737_v14 = vld [vmem:[#allocation7 + $0x10] sm:$0xff]   ;;  %v651_v42 = vunpack.c.l.s4 %v2964_v41  ;;  %v2965_v53 = vmov 839922192   ;;  %s2966_s13 = smov [#allocation8]  }
  0x3a   :  { %v2730_v6 = vld [vmem:[#allocation7 + $0x80] sm:$0xff]   ;;  %2536 = vmatpush3.bf16.msra.mxu0 %v2729_v5  ;;  %v2734_v11 = vld [vmem:[#allocation7 + $0x88] sm:$0xff]   ;;  %v2738_v15 = vld [vmem:[#allocation7 + $0x90] sm:$0xff]   ;;  %v86_v44 = vunpack.c.0.s8 %v85_v40  ;;  %v73_v54 = vunpack.c.l.s4 %v2965_v53  ;;  %v3049_v61 = vsub.s32 0, %v76_v43  ;;  %v3051_v3 = vsub.s32 1, %v76_v43  ;;  %s2347_s14 = sshll.u32 %s2966_s13, 4  ;;  %s2348_s14 = int_to_ptr.vmem [resolvable:$true] %s2347_s14 }
  0x3b   :  { %2558 = vmatpush3.bf16.msra.mxu1 %v2730_v6  ;;  %2537 = vmatprep.subr.bf16.mxu0 %v2731_v8  ;;  %v2739_v16 = vld [vmem:[#allocation7 + $0x58] sm:$0xff]   ;;  %v2743_v20 = vld [vmem:[#allocation7 + $0x60] sm:$0xff]   ;;  %v2747_v24 = vld [vmem:[#allocation7 + $0x68] sm:$0xff]   ;;  %v652_v45 = vunpack.c.0.s8 %v651_v42  ;;  %s2927_s15 = scalar_lea.vmem %s2348_s14, 128  ;;  %p2932_p11 = scmp.lt.s32.totalorder %s2348_s14, %s2348_s14 }
  0x3c   :  { %2724 = vset.pattern.permute.xlu0 %v2962_v7  ;;  %2559 = vmatprep.subr.bf16.mxu1 %v2732_v9  ;;  %v2740_v17 = vld [vmem:[#allocation7 + $0xd8] sm:$0xff]   ;;  %v2744_v21 = vld [vmem:[#allocation7 + $0xe0] sm:$0xff]   ;;  %v2748_v25 = vld [vmem:[#allocation7 + $0xe8] sm:$0xff]   ;;  %v3042_v46 = vsub.s32 %v86_v44, %v76_v43  ;;  %v74_v60 = vunpack.c.0.s8 %v73_v54  ;;  %p2928_p10 = scmp.ne.s32.totalorder %s2348_s14, %s2927_s15  ;;  %p2933_p12 = scmp.lt.s32.totalorder %s2927_s15, %s2927_s15 }
  0x3d   :  { %320 = vperm.xlu0 %2724, %v62_v2   ;;  %v2741_v18 = vld [vmem:[#allocation7 + $0x18] sm:$0xff]   ;;  %v2745_v22 = vld [vmem:[#allocation7 + $0x20] sm:$0xff]   ;;  %v2749_v26 = vld [vmem:[#allocation7 + $0x28] sm:$0xff]   ;;  %v3044_v48 = vsub.s32 %v652_v45, %v76_v43 }
  0x3e   :  { %2538 = vmatpush3.bf16.msra.mxu0 %v2733_v10  ;;  %v2742_v19 = vld [vmem:[#allocation7 + $0x98] sm:$0xff]   ;;  %v2746_v23 = vld [vmem:[#allocation7 + $0xa0] sm:$0xff]   ;;  %v2750_v27 = vld [vmem:[#allocation7 + $0xa8] sm:$0xff]   ;;  %v3056_v10 = vsub.s32 %v74_v60, %v76_v43  ;;  %p2934_p13 = por %p2933_p12, %p2932_p11 }
  0x3f   :  { %2560 = vmatpush3.bf16.msra.mxu1 %v2734_v11  ;;  %2539 = vmatprep.subr.bf16.mxu0 %v2735_v12  ;;  %v2751_v28 = vld [vmem:[#allocation7 + $0x70] sm:$0xff]   ;;  %v2755_v32 = vld [vmem:[#allocation7 + $0x78] sm:$0xff]   ;;  %v2761_v36 = vld [vmem:[#allocation7 + $0x140] sm:$0xff]  }
  0x40   :  { %2561 = vmatprep.subr.bf16.mxu1 %v2736_v13  ;;  %v2752_v29 = vld [vmem:[#allocation7 + $0xf0] sm:$0xff]   ;;  %v2756_v33 = vld [vmem:[#allocation7 + $0xf8] sm:$0xff]   ;;  %v2762_v37 = vld [vmem:[#allocation7 + $0x1c0] sm:$0xff]   ;;  %p2935_p0 = pnand %p2934_p13, %p2928_p10 }
  0x41   :  { %2726 = vset.pattern.permute.xlu0 %v2961_v1  ;;  %v2753_v30 = vld [vmem:[#allocation7 + $0x30] sm:$0xff]   ;;  %v2757_v34 = vld [vmem:[#allocation7 + $0x38] sm:$0xff]  }
  0x42   :  { %2540 = vmatpush3.bf16.msra.mxu0 %v2737_v14  ;;  %v2754_v31 = vld [vmem:[#allocation7 + $0xb0] sm:$0xff]   ;;  %v2758_v35 = vld [vmem:[#allocation7 + $0xb8] sm:$0xff]  }
  0x43   :  { %2562 = vmatpush3.bf16.msra.mxu1 %v2738_v15  ;;  %2541 = vmatprep.subr.bf16.mxu0 %v2739_v16  ;;  %v63_v47 = vld [vmem:[#allocation2] sm:$0xff] }
  0x44   :  { %2563 = vmatprep.subr.bf16.mxu1 %v2740_v17  ;;  %v90_v49 = vrot.slane %v63_v47, %v3042_v46  ;;  %v83_v50 = vcombine.high %v63_v47, %v63_v47  ;;  %v645_v51 = vld [vmem:[#allocation5] sm:$0xff] }
  0x45   :  { %v656_v52 = vrot.slane %v645_v51, %v3044_v48  ;;  %v649_v58 = vcombine.high %v645_v51, %v645_v51 }
  0x46   :  { %2542 = vmatpush3.bf16.msra.mxu0 %v2741_v18  ;;  %v98_v55 = vcombine.high %v90_v49, %v90_v49  ;;  %v97_v56 = vrot.slane %v83_v50, %v3042_v46  ;;  %v330_v57 = vshrl.u32 %v90_v49, 16  ;;  %v152_v62 = vpack.i.b16 %v90_v49, %v90_v49  ;;  %v64_v18 = vld [vmem:[#allocation2 + $0x8] sm:$0xff] }
  0x47   :  { %2564 = vmatpush3.bf16.msra.mxu1 %v2742_v19  ;;  %2543 = vmatprep.subr.bf16.mxu0 %v2743_v20  ;;  %v664_v59 = vcombine.high %v656_v52, %v656_v52  ;;  %v672_v5 = vrot.slane %v656_v52, %v3044_v48  ;;  %v663_v9 = vrot.slane %v649_v58, %v3044_v48  ;;  %v66_v58 = vld [vmem:[#allocation2 + $0x18] sm:$0xff] }
  0x48   :  { %2565 = vmatprep.subr.bf16.mxu1 %v2744_v21  ;;  %v159_v63 = vpack.i.b16 %v98_v55, %v98_v55  ;;  %v337_v1 = vshrl.u32 %v98_v55, 16  ;;  %v99_v2 = vcombine.high %v97_v56, %v97_v56  ;;  %v331_v4 = vpack.i.b16 %v330_v57, %v330_v57 }
  0x49   :  { %v344_v6 = vshrl.u32 %v97_v56, 16  ;;  %v686_v7 = vrot.slane %v664_v59, %v3044_v48  ;;  %v157_v11 = vrot.slane %v152_v62, %v3049_v61  ;;  %v748_v13 = vpack.i.b16 %v672_v5, %v672_v5 }
  0x4a   :  { %2544 = vmatpush3.bf16.msra.mxu0 %v2745_v22  ;;  %v351_v8 = vshrl.u32 %v99_v2, 16  ;;  %v164_v12 = vrot.slane %v159_v63, %v3049_v61  ;;  %v338_v14 = vpack.i.b16 %v337_v1, %v337_v1  ;;  %v166_v16 = vpack.i.b16 %v97_v56, %v97_v56 }
  0x4b   :  { %2566 = vmatpush3.bf16.msra.mxu1 %v2746_v23  ;;  %2545 = vmatprep.subr.bf16.mxu0 %v2747_v24  ;;  %v755_v15 = vpack.i.b16 %v686_v7, %v686_v7  ;;  %v173_v17 = vpack.i.b16 %v99_v2, %v99_v2  ;;  %v336_v19 = vrot.slane %v331_v4, %v3049_v61 }
  0x4c   :  { %2567 = vmatprep.subr.bf16.mxu1 %v2748_v25  ;;  %v520_v20 = vrot.slane %v152_v62, %v3051_v3  ;;  %v345_v21 = vpack.i.b16 %v344_v6, %v344_v6  ;;  %v107_v22 = vrot.slane %v64_v18, %v3042_v46  ;;  %v524_v23 = vrot.slane %v159_v63, %v3051_v3 }
  0x4d   :  { %v352_v24 = vpack.i.b16 %v351_v8, %v351_v8  ;;  %v694_v25 = vcombine.high %v672_v5, %v672_v5  ;;  %v532_v38 = vrot.slane %v173_v17, %v3051_v3  ;;  %v679_v42 = vrot.slane %v663_v9, %v3044_v48 }
  0x4e   :  { %2546 = vmatpush3.bf16.msra.mxu0 %v2749_v26  ;;  %v665_v26 = vcombine.high %v663_v9, %v663_v9  ;;  %v115_v39 = vcombine.high %v107_v22, %v107_v22  ;;  %v3083_v44 = vcombine.low %v520_v20, %v524_v23  ;;  %v180_v52 = vpack.i.b16 %v107_v22, %v107_v22 }
  0x4f   :  { %2568 = vmatpush3.bf16.msra.mxu1 %v2750_v27  ;;  %2547 = vmatprep.subr.bf16.mxu0 %v2751_v28  ;;  %v3064_v27 = vcombine.low %v157_v11, %v164_v12  ;;  %v3067_v28 = vrot.slane %v748_v13, %v3049_v61  ;;  %v357_v40 = vrot.slane %v352_v24, %v3049_v61  ;;  %v358_v53 = vshrl.u32 %v107_v22, 16 }
  0x50   :  { %2569 = vmatprep.subr.bf16.mxu1 %v2752_v29  ;;  %v696_v29 = vcombine.high %v686_v7, %v686_v7  ;;  %v762_v41 = vpack.i.b16 %v694_v25, %v694_v25  ;;  %v693_v43 = vrot.slane %v665_v26, %v3044_v48  ;;  %v187_v56 = vpack.i.b16 %v115_v39, %v115_v39 }
  0x51   :  { %v365_v57 = vshrl.u32 %v115_v39, 16  ;;  %v695_v62 = vcombine.high %v679_v42, %v679_v42  ;;  %v776_v2 = vpack.i.b16 %v679_v42, %v679_v42  ;;  %v185_v6 = vrot.slane %v180_v52, %v3049_v61 }
  0x52   :  { %2548 = vmatpush3.bf16.msra.mxu0 %v2753_v30  ;;  %v100_v30 = vcombine.high %v64_v18, %v64_v18  ;;  %v769_v45 = vpack.i.b16 %v696_v29, %v696_v29  ;;  %v3099_v60 = vrot.slane %v762_v41, %v3049_v61  ;;  %v697_v63 = vcombine.high %v693_v43, %v693_v43 }
  0x53   :  { %2570 = vmatpush3.bf16.msra.mxu1 %v2754_v31  ;;  %2549 = vmatprep.subr.bf16.mxu0 %v2755_v32  ;;  %v343_v31 = vrot.slane %v338_v14, %v3049_v61  ;;  %v3071_v32 = vrot.slane %v755_v15, %v3049_v61  ;;  %v359_v7 = vpack.i.b16 %v358_v53, %v358_v53 }
  0x54   :  { %2571 = vmatprep.subr.bf16.mxu1 %v2756_v33  ;;  %v171_v33 = vrot.slane %v166_v16, %v3049_v61  ;;  %v114_v47 = vrot.slane %v100_v30, %v3042_v46  ;;  %v3102_v1 = vrot.slane %v769_v45, %v3049_v61  ;;  %v783_v8 = vpack.i.b16 %v693_v43, %v693_v43 }
  0x55   :  { %v3088_v50 = vcombine.low %v336_v19, %v343_v31  ;;  %v2381_v51 = vcombine.low %v3067_v28, %v3071_v32  ;;  %v134_v9 = vcombine.high %v66_v58, %v66_v58  ;;  %v192_v11 = vrot.slane %v187_v56, %v3049_v61 }
  0x56   :  { %2550 = vmatpush3.bf16.msra.mxu0 %v2757_v34  ;;  %v178_v34 = vrot.slane %v173_v17, %v3049_v61  ;;  %v116_v4 = vcombine.high %v114_v47, %v114_v47  ;;  %v366_v12 = vpack.i.b16 %v365_v57, %v365_v57  ;;  %v536_v13 = vrot.slane %v180_v52, %v3051_v3  ;;  %v65_v57 = vld [vmem:[#allocation2 + $0x10] sm:$0xff] }
  0x57   :  { %2572 = vmatpush3.bf16.msra.mxu1 %v2758_v35  ;;  %2579 = vmatprep.subr.bf16.mxu0 %v2761_v36  ;;  %v3075_v35 = vld [vmem:[#allocation5 + $0x8] sm:$0xff]  ;;  %v350_v36 = vrot.slane %v345_v21, %v3049_v61  ;;  %v540_v14 = vrot.slane %v187_v56, %v3051_v3  ;;  %v194_v15 = vpack.i.b16 %v114_v47, %v114_v47 }
  0x58   :  { %2601 = vmatprep.subr.bf16.mxu1 %v2762_v37  ;;  %v528_v37 = vrot.slane %v166_v16, %v3051_v3  ;;  %v698_v49 = vcombine.high %v3075_v35, %v3075_v35  ;;  %v3092_v54 = vcombine.low %v171_v33, %v178_v34  ;;  %v372_v16 = vshrl.u32 %v114_v47, 16 }
  0x59   :  { %v3096_v59 = vcombine.low %v350_v36, %v357_v40  ;;  %v790_v17 = vpack.i.b16 %v695_v62, %v695_v62  ;;  %v797_v18 = vpack.i.b16 %v697_v63, %v697_v63  ;;  %v3110_v19 = vrot.slane %v776_v2, %v3049_v61 }
  0x5a   :  { %v3094_v55 = vcombine.low %v528_v37, %v532_v38  ;;  %v712_v5 = vrot.slane %v698_v49, %v3044_v48  ;;  %v201_v20 = vpack.i.b16 %v116_v4, %v116_v4  ;;  %v141_v21 = vrot.slane %v66_v58, %v3042_v46 }
  0x5b   :  { %v2382_v23 = vcombine.low %v3099_v60, %v3102_v1  ;;  %v3116_v24 = vrot.slane %v783_v8, %v3049_v61  ;;  %v379_v25 = vshrl.u32 %v116_v4, 16  ;;  %v148_v26 = vrot.slane %v134_v9, %v3042_v46 }
  0x5c   :  { %v714_v22 = vcombine.high %v712_v5, %v712_v5  ;;  %v3119_v29 = vcombine.low %v185_v6, %v192_v11  ;;  %v364_v30 = vrot.slane %v359_v7, %v3049_v61  ;;  %v371_v31 = vrot.slane %v366_v12, %v3049_v61 }
  0x5d   :  { %v3123_v33 = vcombine.low %v536_v13, %v540_v14  ;;  %v199_v34 = vrot.slane %v194_v15, %v3049_v61  ;;  %v373_v36 = vpack.i.b16 %v372_v16, %v372_v16  ;;  %v3127_v37 = vrot.slane %v790_v17, %v3049_v61 }
  0x5e   :  { %v3130_v38 = vrot.slane %v797_v18, %v3049_v61  ;;  %v206_v39 = vrot.slane %v201_v20, %v3049_v61  ;;  %v149_v40 = vcombine.high %v141_v21, %v141_v21  ;;  %v728_v41 = vrot.slane %v712_v5, %v3044_v48 }
  0x5f   :  { %v742_v42 = vrot.slane %v714_v22, %v3044_v48  ;;  %v2383_v43 = vcombine.low %v3110_v19, %v3116_v24  ;;  %v380_v45 = vpack.i.b16 %v379_v25, %v379_v25  ;;  %v414_v47 = vshrl.u32 %v141_v21, 16 }
  0x60   :  { %v150_v49 = vcombine.high %v148_v26, %v148_v26  ;;  %v3137_v52 = vcombine.low %v364_v30, %v371_v31  ;;  %v544_v53 = vrot.slane %v194_v15, %v3051_v3  ;;  %v548_v56 = vrot.slane %v201_v20, %v3051_v3 }
  0x61   :  { %v421_v58 = vshrl.u32 %v149_v40, 16  ;;  %v378_v62 = vrot.slane %v373_v36, %v3049_v61  ;;  %v2384_v63 = vcombine.low %v3127_v37, %v3130_v38  ;;  %v428_v2 = vshrl.u32 %v148_v26, 16 }
  0x62   :  { %v435_v4 = vshrl.u32 %v150_v49, 16  ;;  %v3144_v5 = vcombine.low %v199_v34, %v206_v39  ;;  %v236_v6 = vpack.i.b16 %v141_v21, %v141_v21  ;;  %v744_v7 = vcombine.high %v728_v41, %v728_v41 }
  0x63   :  { %v746_v8 = vcombine.high %v742_v42, %v742_v42  ;;  %v385_v9 = vrot.slane %v380_v45, %v3049_v61  ;;  %v243_v11 = vpack.i.b16 %v149_v40, %v149_v40  ;;  %v415_v12 = vpack.i.b16 %v414_v47, %v414_v47 }
  0x64   :  { %v250_v13 = vpack.i.b16 %v148_v26, %v148_v26  ;;  %v3147_v14 = vcombine.low %v544_v53, %v548_v56  ;;  %v117_v15 = vcombine.high %v65_v57, %v65_v57  ;;  %v422_v16 = vpack.i.b16 %v421_v58, %v421_v58 }
  0x65   :  { %v257_v17 = vpack.i.b16 %v150_v49, %v150_v49  ;;  %v832_v18 = vpack.i.b16 %v728_v41, %v728_v41  ;;  %v839_v20 = vpack.i.b16 %v742_v42, %v742_v42  ;;  %v429_v22 = vpack.i.b16 %v428_v2, %v428_v2 }
  0x66   :  { %v436_v25 = vpack.i.b16 %v435_v4, %v435_v4  ;;  %v241_v30 = vrot.slane %v236_v6, %v3049_v61  ;;  %v568_v21 = vrot.slane %v236_v6, %v3051_v3  ;;  %v846_v31 = vpack.i.b16 %v744_v7, %v744_v7 }
  0x67   :  { %v853_v34 = vpack.i.b16 %v746_v8, %v746_v8  ;;  %v248_v36 = vrot.slane %v243_v11, %v3049_v61  ;;  %v420_v39 = vrot.slane %v415_v12, %v3049_v61  ;;  %v572_v26 = vrot.slane %v243_v11, %v3051_v3 }
  0x68   :  { %v255_v40 = vrot.slane %v250_v13, %v3049_v61  ;;  %v427_v41 = vrot.slane %v422_v16, %v3049_v61  ;;  %v262_v42 = vrot.slane %v257_v17, %v3049_v61  ;;  %v576_v49 = vrot.slane %v250_v13, %v3051_v3 }
  0x69   :  { %v580_v53 = vrot.slane %v257_v17, %v3051_v3  ;;  %v434_v2 = vrot.slane %v429_v22, %v3049_v61  ;;  %v441_v4 = vrot.slane %v436_v25, %v3049_v61  ;;  %v2368_v6 = vcombine.low %v378_v62, %v385_v9 }
  0x6a   :  { %v3168_v7 = vrot.slane %v65_v57, %v3042_v46  ;;  %v3171_v8 = vrot.slane %v117_v15, %v3042_v46  ;;  %v837_v11 = vrot.slane %v832_v18, %v3049_v61  ;;  %v2363_v12 = vcombine.low %v241_v30, %v248_v36 }
  0x6b   :  { %v2379_v13 = vcombine.low %v568_v21, %v572_v26  ;;  %v844_v16 = vrot.slane %v839_v20, %v3049_v61  ;;  %v851_v17 = vrot.slane %v846_v31, %v3049_v61  ;;  %v2380_v22 = vcombine.low %v576_v49, %v580_v53 }
  0x6c   :  { %v858_v25 = vrot.slane %v853_v34, %v3049_v61  ;;  %v2372_v15 = vcombine.low %v434_v2, %v441_v4  ;;  %v400_v1 = vshrl.u32 %v3171_v8, 16 }
  0x6e   :  { %v2388_v49 = vcombine.low %v851_v17, %v858_v25 }
  0xb7   :  { %v70_v45 = vpop.permute.xlu0 %69  ;;  %v508_v47 = vpop.permute.xlu1 %507 }
  0xb8   :  { %v3160_v56 = vrot.slane %v70_v45, %v3056_v10  ;;  %v3163_v58 = vrot.slane %v508_v47, %v3056_v10  ;;  %v2371_v45 = vcombine.low %v420_v39, %v427_v41  ;;  %v2364_v47 = vcombine.low %v255_v40, %v262_v42 }
  0xb9   :  { %v2387_v42 = vcombine.low %v837_v11, %v844_v16 }
  0xba   :  { %v311_v57 = vmul.bf16 %v3064_v27, %v3160_v56  ;;  %v629_v46 = vmul.bf16 %v3083_v44, %v3163_v58  ;;  %v312_v9 = vmul.bf16 %v3092_v54, %v3160_v56  ;;  %v630_v20 = vmul.bf16 %v3094_v55, %v3163_v58 }
  0xbb   :  { %v313_v30 = vmul.bf16 %v3119_v29, %v3160_v56  ;;  %v631_v21 = vmul.bf16 %v3123_v33, %v3163_v58  ;;  %v314_v27 = vmul.bf16 %v3144_v5, %v3160_v56  ;;  %v632_v44 = vmul.bf16 %v3147_v14, %v3163_v58 }
  0xbc   :  { %v321_v62 = vpop.permute.xlu0 %320  ;;  %v317_v54 = vmul.bf16 %v2363_v12, %v3160_v56  ;;  %v318_v34 = vmul.bf16 %v2364_v47, %v3160_v56  ;;  %v636_v36 = vmul.bf16 %v2380_v22, %v3163_v58  ;;  %v705_v12 = vrot.slane %v3075_v35, %v3044_v48 }
  0xbd   :  { %v3184_v18 = vrot.slane %v321_v62, %v3056_v10  ;;  %v635_v10 = vmul.bf16 %v2379_v13, %v3163_v58  ;;  %v386_v35 = vshrl.u32 %v3168_v7, 16  ;;  %v133_v22 = vcombine.high %v3171_v8, %v3171_v8  ;;  %v2763_v62 = vld [vmem:[#allocation7 + $0x100] sm:$0xff]  }
  0xbf   :  { %v490_v31 = vmul.bf16 %v3088_v50, %v3184_v18  ;;  %v491_v55 = vmul.bf16 %v3096_v59, %v3184_v18  ;;  %v492_v29 = vmul.bf16 %v3137_v52, %v3184_v18  ;;  %v493_v33 = vmul.bf16 %v2368_v6, %v3184_v18 }
  0xc0   :  { %v496_v5 = vmul.bf16 %v2371_v45, %v3184_v18  ;;  %v497_v14 = vmul.bf16 %v2372_v15, %v3184_v18  ;;  %v132_v6 = vcombine.high %v3168_v7, %v3168_v7  ;;  %v407_v24 = vshrl.u32 %v133_v22, 16  ;;  %v2767_v15 = vld [vmem:[#allocation7 + $0x1c8] sm:$0xff]  }
  0xc1   :  { %v498_v39 = vadd.bf16 %v490_v31, %v311_v57  ;;  %v499_v26 = vadd.bf16 %v491_v55, %v312_v9  ;;  %v500_v40 = vadd.bf16 %v492_v29, %v313_v30  ;;  %v501_v50 = vadd.bf16 %v493_v33, %v314_v27  ;;  %v2764_v57 = vld [vmem:[#allocation7 + $0x180] sm:$0xff]   ;;  %v2766_v9 = vld [vmem:[#allocation7 + $0x148] sm:$0xff]   ;;  %v2770_v33 = vld [vmem:[#allocation7 + $0x150] sm:$0xff]  }
  0xc2   :  { %v504_v41 = vadd.bf16 %v496_v5, %v317_v54  ;;  %v505_v59 = vadd.bf16 %v497_v14, %v318_v34  ;;  %v393_v60 = vshrl.u32 %v132_v6, 16  ;;  %v408_v54 = vpack.i.b16 %v407_v24, %v407_v24  ;;  %v2769_v31 = vld [vmem:[#allocation7 + $0x188] sm:$0xff]   ;;  %v2771_v5 = vld [vmem:[#allocation7 + $0x1d0] sm:$0xff]  }
  0xc3   :  { %v637_v53 = vadd.bf16 %v629_v46, %v498_v39  ;;  %v638_v52 = vadd.bf16 %v630_v20, %v499_v26  ;;  %v639_v2 = vadd.bf16 %v631_v21, %v500_v40  ;;  %v640_v4 = vadd.bf16 %v632_v44, %v501_v50 }
  0xc4   :  { %v643_v13 = vadd.bf16 %v635_v10, %v504_v41  ;;  %v644_v45 = vadd.bf16 %v636_v36, %v505_v59  ;;  %v713_v46 = vcombine.high %v705_v12, %v705_v12  ;;  %v387_v20 = vpack.i.b16 %v386_v35, %v386_v35  ;;  %v2768_v10 = vld [vmem:[#allocation7 + $0x108] sm:$0xff]   ;;  %v2772_v41 = vld [vmem:[#allocation7 + $0x110] sm:$0xff]  }
  0xc5   :  { %v907_v47 = vadd.bf16 %v2381_v51, %v637_v53  ;;  %v908_v11 = vadd.bf16 %v2382_v23, %v638_v52  ;;  %v909_v16 = vadd.bf16 %v2383_v43, %v639_v2  ;;  %v910_v17 = vadd.bf16 %v2384_v63, %v640_v4  ;;  %v2775_v53 = vld [vmem:[#allocation7 + $0x1d8] sm:$0xff]  }
  0xc6   :  { %v3228_v25 = vadd.bf16 %v2387_v42, %v643_v13  ;;  %v3230_v28 = vadd.bf16 %v2388_v49, %v644_v45  ;;  %v394_v30 = vpack.i.b16 %v393_v60, %v393_v60  ;;  %v401_v21 = vpack.i.b16 %v400_v1, %v400_v1  ;;  %v2773_v42 = vld [vmem:[#allocation7 + $0x190] sm:$0xff]   ;;  %v2774_v49 = vld [vmem:[#allocation7 + $0x158] sm:$0xff]  }
  0xc7   :  { %v915_v32 = vmax.bf16 %v2960_v0, %v907_v47  ;;  %v916_v51 = vmax.bf16 %v2960_v0, %v908_v11  ;;  %v3236_v19 = vmax.bf16 %v2960_v0, %v909_v16  ;;  %v3239_v23 = vmax.bf16 %v2960_v0, %v910_v17  ;;  %v2776_v16 = vld [vmem:[#allocation7 + $0x118] sm:$0xff]  }
  0xc8   :  { %v208_v55 = vpack.i.b16 %v3168_v7, %v3168_v7  ;;  %v215_v29 = vpack.i.b16 %v132_v6, %v132_v6  ;;  %v222_v34 = vpack.i.b16 %v3171_v8, %v3171_v8  ;;  %v229_v14 = vpack.i.b16 %v133_v22, %v133_v22  ;;  %v2777_v17 = vld [vmem:[#allocation7 + $0x198] sm:$0xff]   ;;  %v2778_v22 = vld [vmem:[#allocation7 + $0x160] sm:$0xff]  }
  0xc9   :  { %v2390_v37 = vcombine.high %v915_v32, %v915_v32  ;;  %v2392_v38 = vcombine.high %v916_v51, %v916_v51  ;;  %v2389_v43 = vcombine.low %v915_v32, %v915_v32  ;;  %v2391_v63 = vcombine.low %v916_v51, %v916_v51  ;;  %v2779_v32 = vld [vmem:[#allocation7 + $0x1e0] sm:$0xff]  }
  0xca   :  { %v2394_v27 = vcombine.high %v3236_v19, %v3236_v19  ;;  %v2396_v44 = vcombine.high %v3239_v23, %v3239_v23  ;;  %v392_v36 = vrot.slane %v387_v20, %v3049_v61  ;;  %v399_v39 = vrot.slane %v394_v30, %v3049_v61 }
  0xcb   :  { %2035 = vmatprep.mubr.bf16.mxu0 %v2390_v37  ;;  %2075 = vmatprep.mubr.bf16.mxu1 %v2392_v38  ;;  %v721_v26 = vrot.slane %v705_v12, %v3044_v48  ;;  %v735_v40 = vrot.slane %v713_v46, %v3044_v48  ;;  %v406_v7 = vrot.slane %v401_v21, %v3049_v61 }
  0xcc   :  { %2036 = vmatmul.mubr.bf16.vlgmr.msra.gmra.mrb[0].mxu0 %v2389_v43  ;;  %2076 = vmatmul.mubr.bf16.vlgmr.msra.gmra.mrb[0].mxu1 %v2391_v63  ;;  %v413_v50 = vrot.slane %v408_v54, %v3049_v61  ;;  %v213_v8 = vrot.slane %v208_v55, %v3049_v61  ;;  %v220_v59 = vrot.slane %v215_v29, %v3049_v61 }
  0xcd   :  { %2580 = vmatpush3.bf16.msra.mxu0 %v2763_v62  ;;  %2602 = vmatpush3.bf16.msra.mxu1 %v2764_v57  ;;  %v227_v52 = vrot.slane %v222_v34, %v3049_v61  ;;  %v234_v48 = vrot.slane %v229_v14, %v3049_v61  ;;  %v2369_v2 = vcombine.low %v392_v36, %v399_v39  ;;  %v2780_v62 = vld [vmem:[#allocation7 + $0x120] sm:$0xff]   ;;  %v2788_v39 = vld [vmem:[#allocation7 + $0x130] sm:$0xff]  }
  0xce   :  { %2115 = vmatprep.mubr.bf16.mxu0 %v2394_v27  ;;  %2155 = vmatprep.mubr.bf16.mxu1 %v2396_v44  ;;  %v552_v4 = vrot.slane %v208_v55, %v3051_v3  ;;  %v556_v6 = vrot.slane %v215_v29, %v3051_v3  ;;  %v560_v12 = vrot.slane %v222_v34, %v3051_v3  ;;  %v2781_v57 = vld [vmem:[#allocation7 + $0x1a0] sm:$0xff]   ;;  %v2784_v55 = vld [vmem:[#allocation7 + $0x128] sm:$0xff]  }
  0xcf   :  { %2581 = vmatprep.subr.bf16.mxu0 %v2766_v9  ;;  %2603 = vmatprep.subr.bf16.mxu1 %v2767_v15  ;;  %v2370_v13 = vcombine.low %v406_v7, %v413_v50  ;;  %v564_v45 = vrot.slane %v229_v14, %v3051_v3  ;;  %v743_v47 = vcombine.high %v721_v26, %v721_v26  ;;  %v2782_v9 = vld [vmem:[#allocation7 + $0x168] sm:$0xff]   ;;  %v2792_v50 = vld [vmem:[#allocation7 + $0x138] sm:$0xff]  }
  0xd0   :  { %v745_v11 = vcombine.high %v735_v40, %v735_v40  ;;  %v2361_v35 = vcombine.low %v213_v8, %v220_v59  ;;  %v2362_v51 = vcombine.low %v227_v52, %v234_v48  ;;  %v494_v60 = vmul.bf16 %v2369_v2, %v3184_v18  ;;  %v2783_v15 = vld [vmem:[#allocation7 + $0x1e8] sm:$0xff]   ;;  %v2795_v8 = vld [vmem:[#allocation7 + $0x2c0] sm:$0xff]  }
  0xd1   :  { %2582 = vmatpush3.bf16.msra.mxu0 %v2768_v10  ;;  %2604 = vmatpush3.bf16.msra.mxu1 %v2769_v31  ;;  %v2377_v1 = vcombine.low %v552_v4, %v556_v6  ;;  %v804_v24 = vpack.i.b16 %v721_v26, %v721_v26  ;;  %v811_v37 = vpack.i.b16 %v735_v40, %v735_v40  ;;  %v2785_v29 = vld [vmem:[#allocation7 + $0x1a8] sm:$0xff]   ;;  %v2790_v26 = vld [vmem:[#allocation7 + $0x178] sm:$0xff]   ;;  %v2797_v2 = vld [vmem:[#allocation7 + $0x280] sm:$0xff]  }
  0xd2   :  { %2583 = vmatprep.subr.bf16.mxu0 %v2770_v33  ;;  %2605 = vmatprep.subr.bf16.mxu1 %v2771_v5  ;;  %v495_v38 = vmul.bf16 %v2370_v13, %v3184_v18  ;;  %v2378_v3 = vcombine.low %v560_v12, %v564_v45  ;;  %v818_v43 = vpack.i.b16 %v743_v47, %v743_v47  ;;  %v2787_v33 = vld [vmem:[#allocation7 + $0x1f0] sm:$0xff]   ;;  %v2799_v6 = vld [vmem:[#allocation7 + $0x248] sm:$0xff]  }
  0xd3   :  { %v825_v63 = vpack.i.b16 %v745_v11, %v745_v11  ;;  %v315_v46 = vmul.bf16 %v2361_v35, %v3160_v56  ;;  %v316_v20 = vmul.bf16 %v2362_v51, %v3160_v56  ;;  %v633_v21 = vmul.bf16 %v2377_v1, %v3163_v58  ;;  %v2786_v56 = vld [vmem:[#allocation7 + $0x170] sm:$0xff]   ;;  %v2800_v12 = vld [vmem:[#allocation7 + $0x2c8] sm:$0xff]   ;;  %v2808_v35 = vld [vmem:[#allocation7 + $0x2d8] sm:$0xff]  }
  0xd4   :  { %v809_v18 = vrot.slane %v804_v24, %v3049_v61  ;;  %v816_v27 = vrot.slane %v811_v37, %v3049_v61  ;;  %v634_v54 = vmul.bf16 %v2378_v3, %v3163_v58  ;;  %v823_v10 = vrot.slane %v818_v43, %v3049_v61  ;;  %v2789_v58 = vld [vmem:[#allocation7 + $0x1b0] sm:$0xff]   ;;  %v2801_v45 = vld [vmem:[#allocation7 + $0x208] sm:$0xff]   ;;  %v2811_v51 = vld [vmem:[#allocation7 + $0x260] sm:$0xff]  }
  0xd5   :  { %2584 = vmatpush3.bf16.msra.mxu0 %v2772_v41  ;;  %2606 = vmatpush3.bf16.msra.mxu1 %v2773_v42  ;;  %v502_v30 = vadd.bf16 %v494_v60, %v315_v46  ;;  %v503_v44 = vadd.bf16 %v495_v38, %v316_v20  ;;  %v830_v31 = vrot.slane %v825_v63, %v3049_v61  ;;  %v2791_v61 = vld [vmem:[#allocation7 + $0x1f8] sm:$0xff]   ;;  %v2794_v42 = vld [vmem:[#allocation7 + $0x240] sm:$0xff]   ;;  %v2804_v47 = vld [vmem:[#allocation7 + $0x2d0] sm:$0xff]  }
  0xd6   :  { %2585 = vmatprep.subr.bf16.mxu0 %v2774_v49  ;;  %2607 = vmatprep.subr.bf16.mxu1 %v2775_v53  ;;  %v2385_v34 = vcombine.low %v809_v18, %v816_v27  ;;  %v2793_v41 = vld [vmem:[#allocation7 + $0x1b8] sm:$0xff]   ;;  %v2796_v53 = vld [vmem:[#allocation7 + $0x200] sm:$0xff]   ;;  %v2393_v52 = vcombine.low %v3236_v19, %v3236_v19  ;;  %v2395_v48 = vcombine.low %v3239_v23, %v3239_v23  ;;  %v2802_v19 = vld [vmem:[#allocation7 + $0x288] sm:$0xff]  }
  0xd7   :  { %v641_v5 = vadd.bf16 %v633_v21, %v502_v30  ;;  %v642_v14 = vadd.bf16 %v634_v54, %v503_v44  ;;  %v2386_v36 = vcombine.low %v823_v10, %v830_v31  ;;  %v2803_v23 = vld [vmem:[#allocation7 + $0x250] sm:$0xff]   ;;  %v2812_v60 = vld [vmem:[#allocation7 + $0x2e0] sm:$0xff]   ;;  %v2815_v37 = vld [vmem:[#allocation7 + $0x268] sm:$0xff]   ;;  %v3289_v27 = vmax.bf16 %v2960_v0, %v3228_v25 }
  0xd8   :  { %v2805_v11 = vld [vmem:[#allocation7 + $0x210] sm:$0xff]   ;;  %v2813_v1 = vld [vmem:[#allocation7 + $0x220] sm:$0xff]   ;;  %v2816_v38 = vld [vmem:[#allocation7 + $0x2e8] sm:$0xff]   ;;  %v3293_v54 = vmax.bf16 %v2960_v0, %v3230_v28 }
  0xd9   :  { %2586 = vmatpush3.bf16.msra.mxu0 %v2776_v16  ;;  %2608 = vmatpush3.bf16.msra.mxu1 %v2777_v17  ;;  %v911_v40 = vadd.bf16 %v2385_v34, %v641_v5  ;;  %v912_v7 = vadd.bf16 %v2386_v36, %v642_v14  ;;  %v2806_v16 = vld [vmem:[#allocation7 + $0x290] sm:$0xff]   ;;  %v2807_v17 = vld [vmem:[#allocation7 + $0x258] sm:$0xff]   ;;  %v2814_v24 = vld [vmem:[#allocation7 + $0x2a0] sm:$0xff]   ;;  %v2402_v25 = vcombine.high %v3289_v27, %v3289_v27 }
  0xda   :  { %2587 = vmatprep.subr.bf16.mxu0 %v2778_v22  ;;  %2609 = vmatprep.subr.bf16.mxu1 %v2779_v32  ;;  %v2809_v22 = vld [vmem:[#allocation7 + $0x218] sm:$0xff]   ;;  %v2817_v3 = vld [vmem:[#allocation7 + $0x228] sm:$0xff]   ;;  %v2819_v63 = vld [vmem:[#allocation7 + $0x270] sm:$0xff]  }
  0xdb   :  { %v3274_v59 = vmax.bf16 %v2960_v0, %v911_v40  ;;  %v3277_v49 = vmax.bf16 %v2960_v0, %v912_v7  ;;  %v2810_v32 = vld [vmem:[#allocation7 + $0x298] sm:$0xff]   ;;  %v2818_v43 = vld [vmem:[#allocation7 + $0x2a8] sm:$0xff]   ;;  %v2822_v46 = vld [vmem:[#allocation7 + $0x2b0] sm:$0xff]   ;;  %v2404_v0 = vcombine.high %v3293_v54, %v3293_v54 }
  0xdc   :  { %v2825_v20 = vld [vmem:[#allocation7 + $0x238] sm:$0xff]   ;;  %v2827_v21 = vld [vmem:[#allocation7 + $0x340] sm:$0xff]   ;;  %v2835_v28 = vld [vmem:[#allocation7 + $0x308] sm:$0xff]  }
  0xdd   :  { %2588 = vmatpush3.bf16.msra.mxu0 %v2780_v62  ;;  %2610 = vmatpush3.bf16.msra.mxu1 %v2781_v57  ;;  %v2398_v4 = vcombine.high %v3274_v59, %v3274_v59  ;;  %v2400_v13 = vcombine.high %v3277_v49, %v3277_v49  ;;  %v2820_v62 = vld [vmem:[#allocation7 + $0x2f0] sm:$0xff]   ;;  %v2826_v30 = vld [vmem:[#allocation7 + $0x2b8] sm:$0xff]   ;;  %v2828_v18 = vld [vmem:[#allocation7 + $0x3c0] sm:$0xff]   ;;  %v2397_v10 = vcombine.low %v3274_v59, %v3274_v59 }
  0xde   :  { %2589 = vmatprep.subr.bf16.mxu0 %v2782_v9  ;;  %2611 = vmatprep.subr.bf16.mxu1 %v2783_v15  ;;  %v2821_v57 = vld [vmem:[#allocation7 + $0x230] sm:$0xff]   ;;  %v2823_v9 = vld [vmem:[#allocation7 + $0x278] sm:$0xff]   ;;  %v2829_v44 = vld [vmem:[#allocation7 + $0x300] sm:$0xff]  }
  0xdf   :  { %v2824_v15 = vld [vmem:[#allocation7 + $0x2f8] sm:$0xff]   ;;  %v2831_v31 = vld [vmem:[#allocation7 + $0x380] sm:$0xff]   ;;  %v2837_v5 = vld [vmem:[#allocation7 + $0x350] sm:$0xff]  }
  0xe0   :  { %v2838_v34 = vld [vmem:[#allocation7 + $0x3d0] sm:$0xff]   ;;  %v2845_v40 = vld [vmem:[#allocation7 + $0x360] sm:$0xff]   ;;  %v2851_v59 = vld [vmem:[#allocation7 + $0x328] sm:$0xff]  }
  0xe1   :  { %2590 = vmatpush3.bf16.msra.mxu0 %v2784_v55  ;;  %2612 = vmatpush3.bf16.msra.mxu1 %v2785_v29  ;;  %v2399_v55 = vcombine.low %v3277_v49, %v3277_v49  ;;  %v2833_v29 = vld [vmem:[#allocation7 + $0x348] sm:$0xff]   ;;  %v2839_v14 = vld [vmem:[#allocation7 + $0x310] sm:$0xff]   ;;  %v2846_v7 = vld [vmem:[#allocation7 + $0x3e0] sm:$0xff]  }
  0xe2   :  { %2591 = vmatprep.subr.bf16.mxu0 %v2786_v56  ;;  %2613 = vmatprep.subr.bf16.mxu1 %v2787_v33  ;;  %v2834_v56 = vld [vmem:[#allocation7 + $0x3c8] sm:$0xff]   ;;  %v2840_v36 = vld [vmem:[#allocation7 + $0x390] sm:$0xff]  }
  0xe3   :  { %v2836_v33 = vld [vmem:[#allocation7 + $0x388] sm:$0xff]  }
  0xe4   :  { %v2852_v49 = vld [vmem:[#allocation7 + $0x3a8] sm:$0xff]  }
  0xe5   :  { %2592 = vmatpush3.bf16.msra.mxu0 %v2788_v39  ;;  %2614 = vmatpush3.bf16.msra.mxu1 %v2789_v58  ;;  %v2841_v39 = vld [vmem:[#allocation7 + $0x358] sm:$0xff]  }
  0xe6   :  { %2593 = vmatprep.subr.bf16.mxu0 %v2790_v26  ;;  %2615 = vmatprep.subr.bf16.mxu1 %v2791_v61  ;;  %v2842_v58 = vld [vmem:[#allocation7 + $0x3d8] sm:$0xff]  }
  0xe7   :  { %v2843_v26 = vld [vmem:[#allocation7 + $0x318] sm:$0xff]  }
  0xe8   :  { %v2844_v61 = vld [vmem:[#allocation7 + $0x398] sm:$0xff]  }
  0xe9   :  { %2594 = vmatpush3.bf16.msra.mxu0 %v2792_v50  ;;  %2616 = vmatpush3.bf16.msra.mxu1 %v2793_v41  ;;  %v2847_v50 = vld [vmem:[#allocation7 + $0x320] sm:$0xff]  }
  0xea   :  { %2623 = vmatprep.subr.bf16.mxu0 %v2794_v42  ;;  %2645 = vmatprep.subr.bf16.mxu1 %v2795_v8  ;;  %v2848_v41 = vld [vmem:[#allocation7 + $0x3a0] sm:$0xff]   ;;  %v2849_v42 = vld [vmem:[#allocation7 + $0x368] sm:$0xff]  }
  0xeb   :  { %v2850_v8 = vld [vmem:[#allocation7 + $0x3e8] sm:$0xff]  }
  0xec   :  { %2116 = vmatmul.mubr.bf16.vlgmr.msra.gmra.mrb[4].mxu0 %v2393_v52  ;;  %2156 = vmatmul.mubr.bf16.vlgmr.msra.gmra.mrb[4].mxu1 %v2395_v48  ;;  %v2854_v52 = vld [vmem:[#allocation7 + $0x3f0] sm:$0xff]  }
  0xed   :  { %2624 = vmatpush3.bf16.msra.mxu0 %v2796_v53  ;;  %2195 = vmatprep.mubr.bf16.mxu0 %v2398_v4  ;;  %v2853_v53 = vld [vmem:[#allocation7 + $0x370] sm:$0xff]   ;;  %v2857_v4 = vld [vmem:[#allocation7 + $0x378] sm:$0xff]  }
  0xee   :  { %2646 = vmatpush3.bf16.msra.mxu1 %v2797_v2  ;;  %2235 = vmatprep.mubr.bf16.mxu1 %v2400_v13  ;;  %v2855_v48 = vld [vmem:[#allocation7 + $0x330] sm:$0xff]   ;;  %v2860_v13 = vld [vmem:[#allocation7 + $0x3b8] sm:$0xff]  }
  0xef   :  { %2625 = vmatprep.subr.bf16.mxu0 %v2799_v6  ;;  %2647 = vmatprep.subr.bf16.mxu1 %v2800_v12  ;;  %v2856_v2 = vld [vmem:[#allocation7 + $0x3b0] sm:$0xff]   ;;  %v2858_v6 = vld [vmem:[#allocation7 + $0x3f8] sm:$0xff]  }
  0xf0   :  { %v2859_v12 = vld [vmem:[#allocation7 + $0x338] sm:$0xff]  }
  0xf1   :  { %2626 = vmatpush3.bf16.msra.mxu0 %v2801_v45  ;;  %v2401_v45 = vcombine.low %v3289_v27, %v3289_v27 }
  0xf2   :  { %2648 = vmatpush3.bf16.msra.mxu1 %v2802_v19  ;;  %2627 = vmatprep.subr.bf16.mxu0 %v2803_v23  ;;  %v2403_v19 = vcombine.low %v3293_v54, %v3293_v54 }
  0xf3   :  { %2649 = vmatprep.subr.bf16.mxu1 %v2804_v47 }
  0xf5   :  { %2628 = vmatpush3.bf16.msra.mxu0 %v2805_v11 }
  0xf6   :  { %2650 = vmatpush3.bf16.msra.mxu1 %v2806_v16  ;;  %2629 = vmatprep.subr.bf16.mxu0 %v2807_v17 }
  0xf7   :  { %2651 = vmatprep.subr.bf16.mxu1 %v2808_v35 }
  0xf9   :  { %2630 = vmatpush3.bf16.msra.mxu0 %v2809_v22 }
  0xfa   :  { %2652 = vmatpush3.bf16.msra.mxu1 %v2810_v32  ;;  %2631 = vmatprep.subr.bf16.mxu0 %v2811_v51 }
  0xfb   :  { %2653 = vmatprep.subr.bf16.mxu1 %v2812_v60 }
  0xfd   :  { %2632 = vmatpush3.bf16.msra.mxu0 %v2813_v1 }
  0xfe   :  { %2654 = vmatpush3.bf16.msra.mxu1 %v2814_v24  ;;  %2633 = vmatprep.subr.bf16.mxu0 %v2815_v37 }
  0xff   :  { %2655 = vmatprep.subr.bf16.mxu1 %v2816_v38 }
 0x101   :  { %2634 = vmatpush3.bf16.msra.mxu0 %v2817_v3 }
 0x102   :  { %2656 = vmatpush3.bf16.msra.mxu1 %v2818_v43  ;;  %2635 = vmatprep.subr.bf16.mxu0 %v2819_v63 }
 0x103   :  { %2657 = vmatprep.subr.bf16.mxu1 %v2820_v62 }
 0x105   :  { %2636 = vmatpush3.bf16.msra.mxu0 %v2821_v57 }
 0x106   :  { %2658 = vmatpush3.bf16.msra.mxu1 %v2822_v46  ;;  %2637 = vmatprep.subr.bf16.mxu0 %v2823_v9 }
 0x107   :  { %2659 = vmatprep.subr.bf16.mxu1 %v2824_v15 }
 0x109   :  { %2638 = vmatpush3.bf16.msra.mxu0 %v2825_v20 }
 0x10a   :  { %2660 = vmatpush3.bf16.msra.mxu1 %v2826_v30  ;;  %2667 = vmatprep.subr.bf16.mxu0 %v2827_v21 }
 0x10b   :  { %2689 = vmatprep.subr.bf16.mxu1 %v2828_v18 }
 0x10c   :  { %2196 = vmatmul.mubr.bf16.vlgmr.msra.gmra.mrb[8].mxu0 %v2397_v10 }
 0x10d   :  { %2236 = vmatmul.mubr.bf16.vlgmr.msra.gmra.mrb[8].mxu1 %v2399_v55  ;;  %2668 = vmatpush3.bf16.msra.mxu0 %v2829_v44 }
 0x10e   :  { %2275 = vmatprep.mubr.bf16.mxu0 %v2402_v25  ;;  %2690 = vmatpush3.bf16.msra.mxu1 %v2831_v31 }
 0x10f   :  { %2315 = vmatprep.mubr.bf16.mxu1 %v2404_v0  ;;  %2669 = vmatprep.subr.bf16.mxu0 %v2833_v29 }
 0x110   :  { %2691 = vmatprep.subr.bf16.mxu1 %v2834_v56 }
 0x111   :  { %2670 = vmatpush3.bf16.msra.mxu0 %v2835_v28 }
 0x112   :  { %2692 = vmatpush3.bf16.msra.mxu1 %v2836_v33  ;;  %2671 = vmatprep.subr.bf16.mxu0 %v2837_v5 }
 0x113   :  { %2693 = vmatprep.subr.bf16.mxu1 %v2838_v34 }
 0x115   :  { %2672 = vmatpush3.bf16.msra.mxu0 %v2839_v14 }
 0x116   :  { %2694 = vmatpush3.bf16.msra.mxu1 %v2840_v36  ;;  %2673 = vmatprep.subr.bf16.mxu0 %v2841_v39 }
 0x117   :  { %2695 = vmatprep.subr.bf16.mxu1 %v2842_v58 }
 0x119   :  { %2674 = vmatpush3.bf16.msra.mxu0 %v2843_v26 }
 0x11a   :  { %2696 = vmatpush3.bf16.msra.mxu1 %v2844_v61  ;;  %2675 = vmatprep.subr.bf16.mxu0 %v2845_v40  ;;  %v2533_v40 = vld [vmem:[%s3329_s4] ss:$0 sm:$0xff] }
 0x11b   :  { %2697 = vmatprep.subr.bf16.mxu1 %v2846_v7 }
 0x11d   :  { %2676 = vmatpush3.bf16.msra.mxu0 %v2847_v50  ;;  %v2534_v50 = vld [vmem:[%s3330_s5] ss:$0 sm:$0xff] }
 0x11e   :  { %2698 = vmatpush3.bf16.msra.mxu1 %v2848_v41  ;;  %2677 = vmatprep.subr.bf16.mxu0 %v2849_v42 }
 0x11f   :  { %2699 = vmatprep.subr.bf16.mxu1 %v2850_v8 }
 0x121   :  { %2678 = vmatpush3.bf16.msra.mxu0 %v2851_v59 }
 0x122   :  { %2700 = vmatpush3.bf16.msra.mxu1 %v2852_v49  ;;  %2679 = vmatprep.subr.bf16.mxu0 %v2853_v53 }
 0x123   :  { %2701 = vmatprep.subr.bf16.mxu1 %v2854_v52 }
 0x125   :  { %2680 = vmatpush3.bf16.msra.mxu0 %v2855_v48 }
 0x126   :  { %2702 = vmatpush3.bf16.msra.mxu1 %v2856_v2  ;;  %2681 = vmatprep.subr.bf16.mxu0 %v2857_v4 }
 0x127   :  { %2703 = vmatprep.subr.bf16.mxu1 %v2858_v6 }
 0x129   :  { %2682 = vmatpush3.bf16.msra.mxu0 %v2859_v12 }
 0x12a   :  { %2704 = vmatpush3.bf16.msra.mxu1 %v2860_v13 }
 0x12c   :  { %2276 = vmatmul.mubr.bf16.vlgmr.msra.gmra.mrb[12].mxu0 %v2401_v45 }
 0x12d   :  { %2316 = vmatmul.mubr.bf16.vlgmr.msra.gmra.mrb[12].mxu1 %v2403_v19 }
 0x19f   :  { %v2551_v23 = vpop.f32.mrb[0].mxu0  ;;  %v2573_v47 = vpop.f32.mrb[0].mxu1 }
 0x1a0   :  { %v2552_v11 = vpop.f32.mrb[1].mxu0  ;;  %v2574_v16 = vpop.f32.mrb[1].mxu1 }
 0x1a1   :  { %v2553_v17 = vadd.f32 %v2552_v11, %v2551_v23  ;;  %v2575_v35 = vadd.f32 %v2574_v16, %v2573_v47  ;;  %v2554_v22 = vpop.f32.mrb[2].mxu0  ;;  %v2576_v32 = vpop.f32.mrb[2].mxu1 }
 0x1a2   :  { %v2555_v51 = vpop.f32.mrb[3].mxu0  ;;  %v2577_v60 = vpop.f32.mrb[3].mxu1 }
 0x1a3   :  { %v2078_v1 = vadd.f32 %v2575_v35, %v2553_v17 }
 0x1bf   :  { %v2595_v24 = vpop.f32.mrb[4].mxu0  ;;  %v2617_v37 = vpop.f32.mrb[4].mxu1 }
 0x1c0   :  { %v2596_v38 = vpop.f32.mrb[5].mxu0  ;;  %v2618_v3 = vpop.f32.mrb[5].mxu1 }
 0x1c1   :  { %v2597_v43 = vadd.f32 %v2596_v38, %v2595_v24  ;;  %v2619_v63 = vadd.f32 %v2618_v3, %v2617_v37  ;;  %v2598_v62 = vpop.f32.mrb[6].mxu0  ;;  %v2620_v57 = vpop.f32.mrb[6].mxu1 }
 0x1c2   :  { %v2599_v46 = vpop.f32.mrb[7].mxu0  ;;  %v2621_v9 = vpop.f32.mrb[7].mxu1 }
 0x1c3   :  { %v2118_v15 = vadd.f32 %v2597_v43, %v2078_v1 }
 0x1c5   :  { %v2158_v20 = vadd.f32 %v2619_v63, %v2118_v15 }
 0x1df   :  { %v2639_v30 = vpop.f32.mrb[8].mxu0 }
 0x1e0   :  { %v2661_v21 = vpop.f32.mrb[8].mxu1  ;;  %v2640_v18 = vpop.f32.mrb[9].mxu0 }
 0x1e1   :  { %v2641_v27 = vadd.f32 %v2640_v18, %v2639_v30  ;;  %v2662_v44 = vpop.f32.mrb[9].mxu1  ;;  %v2642_v54 = vpop.f32.mrb[10].mxu0 }
 0x1e2   :  { %v2663_v10 = vadd.f32 %v2662_v44, %v2661_v21  ;;  %v2664_v31 = vpop.f32.mrb[10].mxu1  ;;  %v2643_v55 = vpop.f32.mrb[11].mxu0 }
 0x1e3   :  { %v2198_v29 = vadd.f32 %v2641_v27, %v2158_v20  ;;  %v2665_v25 = vpop.f32.mrb[11].mxu1 }
 0x1e5   :  { %v2238_v56 = vadd.f32 %v2663_v10, %v2198_v29 }
 0x1ff   :  { %v2683_v0 = vpop.f32.mrb[12].mxu0 }
 0x200   :  { %v2705_v28 = vpop.f32.mrb[12].mxu1  ;;  %v2684_v33 = vpop.f32.mrb[13].mxu0 }
 0x201   :  { %v2685_v5 = vadd.f32 %v2684_v33, %v2683_v0  ;;  %v2706_v34 = vpop.f32.mrb[13].mxu1  ;;  %v2686_v14 = vpop.f32.mrb[14].mxu0 }
 0x202   :  { %v2707_v36 = vadd.f32 %v2706_v34, %v2705_v28  ;;  %v2708_v39 = vpop.f32.mrb[14].mxu1  ;;  %v2687_v58 = vpop.f32.mrb[15].mxu0 }
 0x203   :  { %v2278_v26 = vadd.f32 %v2685_v5, %v2238_v56  ;;  %v2709_v61 = vpop.f32.mrb[15].mxu1 }
 0x205   :  { %v2318_v7 = vadd.f32 %v2707_v36, %v2278_v26 }
 0x207   :  { %v2330_v41 = vmul.f32 %v2533_v40, %v2318_v7 }
 0x209   :  { %v2338_v42 = vadd.f32 %v2534_v50, %v2330_v41 }
 0x20b   :  { %v2339_v8 = vmax.f32 %v2338_v42, 0.0 }
 0x20d   :  { %2340 = vst [vmem:[#allocation8] sm:$0xff] %v2339_v8 }
 0x20e   :  { %2938 = shalt.err (!%p2935_p0)
}
 0x20f   :  { %s2939_s17 = scalar_lea.hbm %s3331_s6, 128 }
 0x210   :  { %p2940_p1 = scmp.ne.s32.totalorder %s3331_s6, %s2939_s17  ;;  %p2943_p2 = scmp.lt.u32.totalorder %s2939_s17, %s3331_s6 }
 0x212   :  { %p2945_p3 = pnand %p2943_p2, %p2940_p1 }
 0x214   :  { %2948 = shalt.err (!%p2945_p3)
}
 0x215   :  { %2350 = dma.vmem_to_hbm [thread:$0]  %s2348_s14, 128, %s3331_s6, [#allocation4]  }
 0x216   :  { %2953 = dma.done.wait [#allocation4], 128  }
 0x217   :  { %2954 = vsyncadd [#allocation4], 4294967168 }
 0x218   :  { %2354 = vsyncpa [#allocation3], 1 }
 0x219   :  { %2355 = vsyncpa [#allocation6], 1 }
 0x21a   :  { %2356 = vsyncpa [#allocation4], 1 }

</bundles_post_ra>
